<compile_context>
chip_gen: v6e
topology: v6e:2x2x1
jax: 0.10.0
libtpu: 0.0.40
codegen_flags: <defaults>
</compile_context>

<pallas_src>
import numpy as np
import jax
import jax.numpy as jnp
from jax.experimental import pallas as pl
from jax.experimental.pallas import tpu as pltpu


def union_kernel(grp_len_smem, grp_off_smem, doc_len_smem,
                 x_ref, gcn_ref, out_x_ref, out_mask_ref):
    """Per-batch prefix compaction + x_gcn broadcast-add + mask build.

    grp_len_smem: (B, N) int32 SMEM -- valid rows per (b, n) group (from mask)
    grp_off_smem: (B, N) int32 SMEM -- exclusive cumsum of grp_len per batch
    doc_len_smem: (B,)   int32 SMEM -- length.sum(-1) (doc_seq_len)
    x_ref       : (S, D) VMEM       -- flattened x for this batch element
    gcn_ref     : (N, D) VMEM       -- x_gcn rows (broadcast along T in-kernel)
    out_x_ref   : (S, D) VMEM
    out_mask_ref: (1, S) VMEM
    """
    b = pl.program_id(0)
    S, D = x_ref.shape
    N, _ = gcn_ref.shape
    T = S // N
    out_dt = out_x_ref.dtype

    def body(n, carry):
        src = pl.multiple_of(n * T, T)

        # Initialize output group n with its gcn row broadcast along T
        # (rows that receive no compacted data keep gcn only, as in the ref).
        g = gcn_ref[pl.ds(n, 1), :]                                    # (1, D)
        out_x_ref[pl.ds(src, T), :] = jnp.broadcast_to(g, (T, D)).astype(out_dt)

        # Accumulate the compacted (prefix-valid) rows of source group n into
        # the output at the running destination offset.  The tail rows beyond
        # L are masked to zero so the full-T RMW is harmless.
        L = grp_len_smem[b, n]
        dest = grp_off_smem[b, n]
        rows = jax.lax.broadcasted_iota(jnp.int32, (T, 1), 0)
        blk = jnp.where(rows < L, x_ref[pl.ds(src, T), :], 0).astype(out_dt)
        out_x_ref[pl.ds(dest, T), :] = out_x_ref[pl.ds(dest, T), :] + blk
        return carry

    jax.lax.fori_loop(0, N, body, 0, unroll=True)

    # new_mask[b, :doc_seq_len[b]] = 1
    Ltot = doc_len_smem[b]
    pos = jax.lax.broadcasted_iota(jnp.int32, (1, S), 1)
    out_mask_ref[...] = (pos < Ltot).astype(out_mask_ref.dtype)


def union_layer(x, x_gcn, mask, length, max_doc_seq_len=None):
    """Eval-mode forward of UnionLayer.

    Returns (new_x, new_mask, doc_seq_len, None).  If `max_doc_seq_len` is
    given (static Python int) the outputs are truncated like the PyTorch
    module; otherwise the padded (B, N*T, .) outputs are returned and the
    consumer slices (avoids a device->host sync in the forward path).
    """
    B, N, T, D = x.shape
    S = N * T

    x_flat = x.reshape(B, S, D)

    # Per-group valid counts from the mask (module semantics: mask == 1 selects
    # rows; in this model the mask is a contiguous prefix within each group,
    # which is what makes block compaction valid).
    grp_len = (mask.reshape(B, N, T) == 1).astype(jnp.int32).sum(axis=-1)   # (B, N)
    grp_off = jnp.cumsum(grp_len, axis=-1) - grp_len                        # exclusive cumsum
    doc_seq_len = length.astype(jnp.int32).sum(axis=-1)                     # (B,)

    # Rough per-step VMEM budget (double-buffered x + out + small gcn/mask).
    per_step_bytes = (2 * S * D + N * D + S) * x.dtype.itemsize
    vmem_limit = int(min(64 * 1024 * 1024, max(8 * 1024 * 1024, 4 * per_step_bytes)))

    new_x, new_mask = pl.pallas_call(
        union_kernel,
        out_shape=(
            jax.ShapeDtypeStruct((B, S, D), x.dtype),
            jax.ShapeDtypeStruct((B, 1, S), mask.dtype),
        ),
        grid_spec=pltpu.PrefetchScalarGridSpec(
            num_scalar_prefetch=3,            # grp_len, grp_off, doc_seq_len -> SMEM
            grid=(B,),
            in_specs=[
                pl.BlockSpec((None, S, D), lambda b, gl, go, dl: (b, 0, 0)),  # x_flat
                pl.BlockSpec((None, N, D), lambda b, gl, go, dl: (b, 0, 0)),  # x_gcn
            ],
            out_specs=(
                pl.BlockSpec((None, S, D), lambda b, gl, go, dl: (b, 0, 0)),  # new_x
                pl.BlockSpec((None, 1, S), lambda b, gl, go, dl: (b, 0, 0)),  # new_mask
            ),
        ),
        compiler_params=pltpu.CompilerParams(
            dimension_semantics=("parallel",),
            vmem_limit_bytes=vmem_limit),
    )(grp_len, grp_off, doc_seq_len, x_flat, x_gcn)

    new_mask = new_mask.reshape(B, S)
    if max_doc_seq_len is not None:
        new_x = new_x[:, :max_doc_seq_len, :]
        new_mask = new_mask[:, :max_doc_seq_len]

    # TODO(synk): training-only tag compaction (iob_labels_vocab_cls '<pad>' fill)
    # is not implemented; eval path of the module returns None for tags.
    return new_x, new_mask, doc_seq_len, None


def ref_forward(x, x_gcn, mask, length):
    """NumPy reference mirroring the PyTorch eval-mode loop."""
    x = np.asarray(x); x_gcn = np.asarray(x_gcn)
    mask = np.asarray(mask); length = np.asarray(length)
    B, N, T, D = x.shape
    S = N * T
    xf = x.reshape(B, S, D)
    mf = mask.reshape(B, S)
    dsl = length.sum(-1)
    maxl = int(dsl.max())
    new_x = np.zeros_like(xf)
    new_mask = np.zeros_like(mf)
    for i in range(B):
        valid = xf[i][mf[i] == 1]
        new_x[i, :valid.shape[0]] = valid
        new_mask[i, :dsl[i]] = 1
    new_x = new_x[:, :maxl]
    new_mask = new_mask[:, :maxl]
    gcn = np.broadcast_to(x_gcn[:, :, None, :], (B, N, T, D)).reshape(B, S, D)[:, :maxl]
    return gcn + new_x, new_mask, dsl


if __name__ == "__main__":
    key = jax.random.PRNGKey(0)
    B, N, T, D = 2, 4, 8, 32
    k1, k2, k3 = jax.random.split(key, 3)

    x = jax.random.normal(k1, (B, N, T, D), dtype=jnp.float32)
    x_gcn = jax.random.normal(k2, (B, N, D), dtype=jnp.float32)
    length = jax.random.randint(k3, (B, N), 1, T + 1).astype(jnp.int32)   # (B, N)
    t_idx = jnp.arange(T)[None, None, :]
    mask = (t_idx < length[:, :, None]).astype(jnp.float32)               # (B, N, T)

    ref_x, ref_mask, ref_len = ref_forward(x, x_gcn, mask, length)
    max_len = int(ref_len.max())   # static truncation length (host-known in the test)

    new_x, new_mask, doc_seq_len, tags = union_layer(
        x, x_gcn, mask, length, max_doc_seq_len=max_len)
    jax.block_until_ready(new_x)
    jax.block_until_ready(new_mask)

    np.testing.assert_allclose(np.asarray(new_x), ref_x, rtol=1e-5, atol=1e-5)
    np.testing.assert_allclose(np.asarray(new_mask), ref_mask, rtol=0, atol=0)
    np.testing.assert_allclose(np.asarray(doc_seq_len), ref_len, rtol=0, atol=0)
    assert tags is None

    print("KERNEL_OK")
</pallas_src>

<mosaic_0001>
module attributes {stable_mosaic.version = 11 : i64} {
  func.func @union_kernel(%arg0: i32, %arg1: memref<2x4xi32, #tpu.memory_space<smem>>, %arg2: memref<2x4xi32, #tpu.memory_space<smem>>, %arg3: memref<2xi32, #tpu.memory_space<smem>>, %arg4: memref<1x32x32xf32, #tpu.memory_space<vmem>>, %arg5: memref<1x4x32xf32, #tpu.memory_space<vmem>>, %arg6: memref<1x32x32xf32, #tpu.memory_space<vmem>>, %arg7: memref<1x1x32xf32, #tpu.memory_space<vmem>>) attributes {dimension_semantics = [#tpu.dimension_semantics<parallel>], iteration_bounds = array<i64: 2>, scalar_prefetch = 3 : i64, scratch_operands = 0 : i64, tpu.core_type = #tpu.core_type<tc>, window_params = [{transform_indices = @transform_0, window_bounds = array<i64: 1, 32, 32>}, {transform_indices = @transform_1, window_bounds = array<i64: 1, 4, 32>}, {transform_indices = @transform_2, window_bounds = array<i64: 1, 32, 32>}, {transform_indices = @transform_3, window_bounds = array<i64: 1, 1, 32>}]} {
    %c0_i32 = arith.constant 0 : i32
    %c8_i32 = arith.constant 8 : i32
    %0 = arith.muli %c0_i32, %c8_i32 : i32
    %1 = tpu.assume_multiple %0, 8 : i32
    %c0 = arith.constant 0 : index
    %2 = arith.index_cast %c0_i32 : i32 to index
    %c0_0 = arith.constant 0 : index
    %3 = vector.load %arg5[%c0, %2, %c0_0] : memref<1x4x32xf32, #tpu.memory_space<vmem>>, vector<1x1x32xf32>
    %4 = vector.shape_cast %3 : vector<1x1x32xf32> to vector<1x32xf32>
    %5 = vector.shape_cast %4 : vector<1x32xf32> to vector<1x32xf32>
    %6 = vector.broadcast %5 : vector<1x32xf32> to vector<8x32xf32>
    %c0_1 = arith.constant 0 : index
    %7 = arith.index_cast %1 : i32 to index
    %c0_2 = arith.constant 0 : index
    %8 = vector.load %arg6[%c0_1, %7, %c0_2] : memref<1x32x32xf32, #tpu.memory_space<vmem>>, vector<1x8x32xf32>
    %9 = vector.shape_cast %8 : vector<1x8x32xf32> to vector<8x32xf32>
    %10 = vector.shape_cast %6 : vector<8x32xf32> to vector<1x8x32xf32>
    tpu.vector_store %arg6[%c0_1, %7, %c0_2], %10 {strides = array<i32>} : memref<1x32x32xf32, #tpu.memory_space<vmem>>, vector<1x8x32xf32>,
    %11 = arith.index_cast %arg0 : i32 to index
    %12 = arith.index_cast %c0_i32 : i32 to index
    %13 = memref.load %arg1[%11, %12] : memref<2x4xi32, #tpu.memory_space<smem>>
    %14 = arith.index_cast %arg0 : i32 to index
    %15 = arith.index_cast %c0_i32 : i32 to index
    %16 = memref.load %arg2[%14, %15] : memref<2x4xi32, #tpu.memory_space<smem>>
    %17 = tpu.iota {dimensions = array<i32: 0>} : vector<8x1xi32>
    %18 = vector.broadcast %13 : i32 to vector<8x1xi32>
    %19 = arith.cmpi slt, %17, %18 : vector<8x1xi32>
    %c0_3 = arith.constant 0 : index
    %20 = arith.index_cast %1 : i32 to index
    %c0_4 = arith.constant 0 : index
    %21 = vector.load %arg4[%c0_3, %20, %c0_4] : memref<1x32x32xf32, #tpu.memory_space<vmem>>, vector<1x8x32xf32>
    %22 = vector.shape_cast %21 : vector<1x8x32xf32> to vector<8x32xf32>
    %c0_i32_5 = arith.constant 0 : i32
    %23 = arith.sitofp %c0_i32_5 : i32 to f32
    %24 = vector.shape_cast %19 : vector<8x1xi1> to vector<8x1xi1>
    %25 = vector.broadcast %24 : vector<8x1xi1> to vector<8x32xi1>
    %26 = vector.broadcast %23 : f32 to vector<8x32xf32>
    %27 = arith.select %25, %22, %26 : vector<8x32xi1>, vector<8x32xf32>
    %c0_6 = arith.constant 0 : index
    %28 = arith.index_cast %16 : i32 to index
    %c0_7 = arith.constant 0 : index
    %29 = vector.load %arg6[%c0_6, %28, %c0_7] : memref<1x32x32xf32, #tpu.memory_space<vmem>>, vector<1x8x32xf32>
    %30 = vector.shape_cast %29 : vector<1x8x32xf32> to vector<8x32xf32>
    %31 = arith.addf %30, %27 : vector<8x32xf32>
    %c0_8 = arith.constant 0 : index
    %32 = arith.index_cast %16 : i32 to index
    %c0_9 = arith.constant 0 : index
    %33 = vector.load %arg6[%c0_8, %32, %c0_9] : memref<1x32x32xf32, #tpu.memory_space<vmem>>, vector<1x8x32xf32>
    %34 = vector.shape_cast %33 : vector<1x8x32xf32> to vector<8x32xf32>
    %35 = vector.shape_cast %31 : vector<8x32xf32> to vector<1x8x32xf32>
    tpu.vector_store %arg6[%c0_8, %32, %c0_9], %35 {strides = array<i32>} : memref<1x32x32xf32, #tpu.memory_space<vmem>>, vector<1x8x32xf32>,
    %c1_i32 = arith.constant 1 : i32
    %c8_i32_10 = arith.constant 8 : i32
    %36 = arith.muli %c1_i32, %c8_i32_10 : i32
    %37 = tpu.assume_multiple %36, 8 : i32
    %c0_11 = arith.constant 0 : index
    %38 = arith.index_cast %c1_i32 : i32 to index
    %c0_12 = arith.constant 0 : index
    %39 = vector.load %arg5[%c0_11, %38, %c0_12] : memref<1x4x32xf32, #tpu.memory_space<vmem>>, vector<1x1x32xf32>
    %40 = vector.shape_cast %39 : vector<1x1x32xf32> to vector<1x32xf32>
    %41 = vector.shape_cast %40 : vector<1x32xf32> to vector<1x32xf32>
    %42 = vector.broadcast %41 : vector<1x32xf32> to vector<8x32xf32>
    %c0_13 = arith.constant 0 : index
    %43 = arith.index_cast %37 : i32 to index
    %c0_14 = arith.constant 0 : index
    %44 = vector.load %arg6[%c0_13, %43, %c0_14] : memref<1x32x32xf32, #tpu.memory_space<vmem>>, vector<1x8x32xf32>
    %45 = vector.shape_cast %44 : vector<1x8x32xf32> to vector<8x32xf32>
    %46 = vector.shape_cast %42 : vector<8x32xf32> to vector<1x8x32xf32>
    tpu.vector_store %arg6[%c0_13, %43, %c0_14], %46 {strides = array<i32>} : memref<1x32x32xf32, #tpu.memory_space<vmem>>, vector<1x8x32xf32>,
    %47 = arith.index_cast %arg0 : i32 to index
    %48 = arith.index_cast %c1_i32 : i32 to index
    %49 = memref.load %arg1[%47, %48] : memref<2x4xi32, #tpu.memory_space<smem>>
    %50 = arith.index_cast %arg0 : i32 to index
    %51 = arith.index_cast %c1_i32 : i32 to index
    %52 = memref.load %arg2[%50, %51] : memref<2x4xi32, #tpu.memory_space<smem>>
    %53 = tpu.iota {dimensions = array<i32: 0>} : vector<8x1xi32>
    %54 = vector.broadcast %49 : i32 to vector<8x1xi32>
    %55 = arith.cmpi slt, %53, %54 : vector<8x1xi32>
    %c0_15 = arith.constant 0 : index
    %56 = arith.index_cast %37 : i32 to index
    %c0_16 = arith.constant 0 : index
    %57 = vector.load %arg4[%c0_15, %56, %c0_16] : memref<1x32x32xf32, #tpu.memory_space<vmem>>, vector<1x8x32xf32>
    %58 = vector.shape_cast %57 : vector<1x8x32xf32> to vector<8x32xf32>
    %c0_i32_17 = arith.constant 0 : i32
    %59 = arith.sitofp %c0_i32_17 : i32 to f32
    %60 = vector.shape_cast %55 : vector<8x1xi1> to vector<8x1xi1>
    %61 = vector.broadcast %60 : vector<8x1xi1> to vector<8x32xi1>
    %62 = vector.broadcast %59 : f32 to vector<8x32xf32>
    %63 = arith.select %61, %58, %62 : vector<8x32xi1>, vector<8x32xf32>
    %c0_18 = arith.constant 0 : index
    %64 = arith.index_cast %52 : i32 to index
    %c0_19 = arith.constant 0 : index
    %65 = vector.load %arg6[%c0_18, %64, %c0_19] : memref<1x32x32xf32, #tpu.memory_space<vmem>>, vector<1x8x32xf32>
    %66 = vector.shape_cast %65 : vector<1x8x32xf32> to vector<8x32xf32>
    %67 = arith.addf %66, %63 : vector<8x32xf32>
    %c0_20 = arith.constant 0 : index
    %68 = arith.index_cast %52 : i32 to index
    %c0_21 = arith.constant 0 : index
    %69 = vector.load %arg6[%c0_20, %68, %c0_21] : memref<1x32x32xf32, #tpu.memory_space<vmem>>, vector<1x8x32xf32>
    %70 = vector.shape_cast %69 : vector<1x8x32xf32> to vector<8x32xf32>
    %71 = vector.shape_cast %67 : vector<8x32xf32> to vector<1x8x32xf32>
    tpu.vector_store %arg6[%c0_20, %68, %c0_21], %71 {strides = array<i32>} : memref<1x32x32xf32, #tpu.memory_space<vmem>>, vector<1x8x32xf32>,
    %c2_i32 = arith.constant 2 : i32
    %c8_i32_22 = arith.constant 8 : i32
    %72 = arith.muli %c2_i32, %c8_i32_22 : i32
    %73 = tpu.assume_multiple %72, 8 : i32
    %c0_23 = arith.constant 0 : index
    %74 = arith.index_cast %c2_i32 : i32 to index
    %c0_24 = arith.constant 0 : index
    %75 = vector.load %arg5[%c0_23, %74, %c0_24] : memref<1x4x32xf32, #tpu.memory_space<vmem>>, vector<1x1x32xf32>
    %76 = vector.shape_cast %75 : vector<1x1x32xf32> to vector<1x32xf32>
    %77 = vector.shape_cast %76 : vector<1x32xf32> to vector<1x32xf32>
    %78 = vector.broadcast %77 : vector<1x32xf32> to vector<8x32xf32>
    %c0_25 = arith.constant 0 : index
    %79 = arith.index_cast %73 : i32 to index
    %c0_26 = arith.constant 0 : index
    %80 = vector.load %arg6[%c0_25, %79, %c0_26] : memref<1x32x32xf32, #tpu.memory_space<vmem>>, vector<1x8x32xf32>
    %81 = vector.shape_cast %80 : vector<1x8x32xf32> to vector<8x32xf32>
    %82 = vector.shape_cast %78 : vector<8x32xf32> to vector<1x8x32xf32>
    tpu.vector_store %arg6[%c0_25, %79, %c0_26], %82 {strides = array<i32>} : memref<1x32x32xf32, #tpu.memory_space<vmem>>, vector<1x8x32xf32>,
    %83 = arith.index_cast %arg0 : i32 to index
    %84 = arith.index_cast %c2_i32 : i32 to index
    %85 = memref.load %arg1[%83, %84] : memref<2x4xi32, #tpu.memory_space<smem>>
    %86 = arith.index_cast %arg0 : i32 to index
    %87 = arith.index_cast %c2_i32 : i32 to index
    %88 = memref.load %arg2[%86, %87] : memref<2x4xi32, #tpu.memory_space<smem>>
    %89 = tpu.iota {dimensions = array<i32: 0>} : vector<8x1xi32>
    %90 = vector.broadcast %85 : i32 to vector<8x1xi32>
    %91 = arith.cmpi slt, %89, %90 : vector<8x1xi32>
    %c0_27 = arith.constant 0 : index
    %92 = arith.index_cast %73 : i32 to index
    %c0_28 = arith.constant 0 : index
    %93 = vector.load %arg4[%c0_27, %92, %c0_28] : memref<1x32x32xf32, #tpu.memory_space<vmem>>, vector<1x8x32xf32>
    %94 = vector.shape_cast %93 : vector<1x8x32xf32> to vector<8x32xf32>
    %c0_i32_29 = arith.constant 0 : i32
    %95 = arith.sitofp %c0_i32_29 : i32 to f32
    %96 = vector.shape_cast %91 : vector<8x1xi1> to vector<8x1xi1>
    %97 = vector.broadcast %96 : vector<8x1xi1> to vector<8x32xi1>
    %98 = vector.broadcast %95 : f32 to vector<8x32xf32>
    %99 = arith.select %97, %94, %98 : vector<8x32xi1>, vector<8x32xf32>
    %c0_30 = arith.constant 0 : index
    %100 = arith.index_cast %88 : i32 to index
    %c0_31 = arith.constant 0 : index
    %101 = vector.load %arg6[%c0_30, %100, %c0_31] : memref<1x32x32xf32, #tpu.memory_space<vmem>>, vector<1x8x32xf32>
    %102 = vector.shape_cast %101 : vector<1x8x32xf32> to vector<8x32xf32>
    %103 = arith.addf %102, %99 : vector<8x32xf32>
    %c0_32 = arith.constant 0 : index
    %104 = arith.index_cast %88 : i32 to index
    %c0_33 = arith.constant 0 : index
    %105 = vector.load %arg6[%c0_32, %104, %c0_33] : memref<1x32x32xf32, #tpu.memory_space<vmem>>, vector<1x8x32xf32>
    %106 = vector.shape_cast %105 : vector<1x8x32xf32> to vector<8x32xf32>
    %107 = vector.shape_cast %103 : vector<8x32xf32> to vector<1x8x32xf32>
    tpu.vector_store %arg6[%c0_32, %104, %c0_33], %107 {strides = array<i32>} : memref<1x32x32xf32, #tpu.memory_space<vmem>>, vector<1x8x32xf32>,
    %c3_i32 = arith.constant 3 : i32
    %c8_i32_34 = arith.constant 8 : i32
    %108 = arith.muli %c3_i32, %c8_i32_34 : i32
    %109 = tpu.assume_multiple %108, 8 : i32
    %c0_35 = arith.constant 0 : index
    %110 = arith.index_cast %c3_i32 : i32 to index
    %c0_36 = arith.constant 0 : index
    %111 = vector.load %arg5[%c0_35, %110, %c0_36] : memref<1x4x32xf32, #tpu.memory_space<vmem>>, vector<1x1x32xf32>
    %112 = vector.shape_cast %111 : vector<1x1x32xf32> to vector<1x32xf32>
    %113 = vector.shape_cast %112 : vector<1x32xf32> to vector<1x32xf32>
    %114 = vector.broadcast %113 : vector<1x32xf32> to vector<8x32xf32>
    %c0_37 = arith.constant 0 : index
    %115 = arith.index_cast %109 : i32 to index
    %c0_38 = arith.constant 0 : index
    %116 = vector.load %arg6[%c0_37, %115, %c0_38] : memref<1x32x32xf32, #tpu.memory_space<vmem>>, vector<1x8x32xf32>
    %117 = vector.shape_cast %116 : vector<1x8x32xf32> to vector<8x32xf32>
    %118 = vector.shape_cast %114 : vector<8x32xf32> to vector<1x8x32xf32>
    tpu.vector_store %arg6[%c0_37, %115, %c0_38], %118 {strides = array<i32>} : memref<1x32x32xf32, #tpu.memory_space<vmem>>, vector<1x8x32xf32>,
    %119 = arith.index_cast %arg0 : i32 to index
    %120 = arith.index_cast %c3_i32 : i32 to index
    %121 = memref.load %arg1[%119, %120] : memref<2x4xi32, #tpu.memory_space<smem>>
    %122 = arith.index_cast %arg0 : i32 to index
    %123 = arith.index_cast %c3_i32 : i32 to index
    %124 = memref.load %arg2[%122, %123] : memref<2x4xi32, #tpu.memory_space<smem>>
    %125 = tpu.iota {dimensions = array<i32: 0>} : vector<8x1xi32>
    %126 = vector.broadcast %121 : i32 to vector<8x1xi32>
    %127 = arith.cmpi slt, %125, %126 : vector<8x1xi32>
    %c0_39 = arith.constant 0 : index
    %128 = arith.index_cast %109 : i32 to index
    %c0_40 = arith.constant 0 : index
    %129 = vector.load %arg4[%c0_39, %128, %c0_40] : memref<1x32x32xf32, #tpu.memory_space<vmem>>, vector<1x8x32xf32>
    %130 = vector.shape_cast %129 : vector<1x8x32xf32> to vector<8x32xf32>
    %c0_i32_41 = arith.constant 0 : i32
    %131 = arith.sitofp %c0_i32_41 : i32 to f32
    %132 = vector.shape_cast %127 : vector<8x1xi1> to vector<8x1xi1>
    %133 = vector.broadcast %132 : vector<8x1xi1> to vector<8x32xi1>
    %134 = vector.broadcast %131 : f32 to vector<8x32xf32>
    %135 = arith.select %133, %130, %134 : vector<8x32xi1>, vector<8x32xf32>
    %c0_42 = arith.constant 0 : index
    %136 = arith.index_cast %124 : i32 to index
    %c0_43 = arith.constant 0 : index
    %137 = vector.load %arg6[%c0_42, %136, %c0_43] : memref<1x32x32xf32, #tpu.memory_space<vmem>>, vector<1x8x32xf32>
    %138 = vector.shape_cast %137 : vector<1x8x32xf32> to vector<8x32xf32>
    %139 = arith.addf %138, %135 : vector<8x32xf32>
    %c0_44 = arith.constant 0 : index
    %140 = arith.index_cast %124 : i32 to index
    %c0_45 = arith.constant 0 : index
    %141 = vector.load %arg6[%c0_44, %140, %c0_45] : memref<1x32x32xf32, #tpu.memory_space<vmem>>, vector<1x8x32xf32>
    %142 = vector.shape_cast %141 : vector<1x8x32xf32> to vector<8x32xf32>
    %143 = vector.shape_cast %139 : vector<8x32xf32> to vector<1x8x32xf32>
    tpu.vector_store %arg6[%c0_44, %140, %c0_45], %143 {strides = array<i32>} : memref<1x32x32xf32, #tpu.memory_space<vmem>>, vector<1x8x32xf32>,
    %c4_i32 = arith.constant 4 : i32
    %144 = arith.index_cast %arg0 : i32 to index
    %145 = memref.load %arg3[%144] : memref<2xi32, #tpu.memory_space<smem>>
    %146 = tpu.iota {dimensions = array<i32: 1>} : vector<1x32xi32>
    %147 = vector.broadcast %145 : i32 to vector<1x32xi32>
    %148 = arith.cmpi slt, %146, %147 : vector<1x32xi32>
    %149 = arith.extui %148 : vector<1x32xi1> to vector<1x32xi32>
    %150 = arith.sitofp %149 : vector<1x32xi32> to vector<1x32xf32>
    %c0_46 = arith.constant 0 : index
    %c0_47 = arith.constant 0 : index
    %c0_48 = arith.constant 0 : index
    %151 = vector.load %arg7[%c0_46, %c0_47, %c0_48] : memref<1x1x32xf32, #tpu.memory_space<vmem>>, vector<1x1x32xf32>
    %152 = vector.shape_cast %151 : vector<1x1x32xf32> to vector<1x32xf32>
    %153 = vector.shape_cast %150 : vector<1x32xf32> to vector<1x1x32xf32>
    tpu.vector_store %arg7[%c0_46, %c0_47, %c0_48], %153 {strides = array<i32>} : memref<1x1x32xf32, #tpu.memory_space<vmem>>, vector<1x1x32xf32>,
    return
  }
  func.func @transform_0(%arg0: i32, %arg1: memref<2x4xi32, #tpu.memory_space<smem>>, %arg2: memref<2x4xi32, #tpu.memory_space<smem>>, %arg3: memref<2xi32, #tpu.memory_space<smem>>) -> (i32, i32, i32) {
    %c0_i32 = arith.constant 0 : i32
    %c0_i32_0 = arith.constant 0 : i32
    %c0_i32_1 = arith.constant 0 : i32
    return %arg0, %c0_i32, %c0_i32_0 : i32, i32, i32
  }
  func.func @transform_1(%arg0: i32, %arg1: memref<2x4xi32, #tpu.memory_space<smem>>, %arg2: memref<2x4xi32, #tpu.memory_space<smem>>, %arg3: memref<2xi32, #tpu.memory_space<smem>>) -> (i32, i32, i32) {
    %c0_i32 = arith.constant 0 : i32
    %c0_i32_0 = arith.constant 0 : i32
    %c0_i32_1 = arith.constant 0 : i32
    return %arg0, %c0_i32, %c0_i32_0 : i32, i32, i32
  }
  func.func @transform_2(%arg0: i32, %arg1: memref<2x4xi32, #tpu.memory_space<smem>>, %arg2: memref<2x4xi32, #tpu.memory_space<smem>>, %arg3: memref<2xi32, #tpu.memory_space<smem>>) -> (i32, i32, i32) {
    %c0_i32 = arith.constant 0 : i32
    %c0_i32_0 = arith.constant 0 : i32
    %c0_i32_1 = arith.constant 0 : i32
    return %arg0, %c0_i32, %c0_i32_0 : i32, i32, i32
  }
  func.func @transform_3(%arg0: i32, %arg1: memref<2x4xi32, #tpu.memory_space<smem>>, %arg2: memref<2x4xi32, #tpu.memory_space<smem>>, %arg3: memref<2xi32, #tpu.memory_space<smem>>) -> (i32, i32, i32) {
    %c0_i32 = arith.constant 0 : i32
    %c0_i32_0 = arith.constant 0 : i32
    %c0_i32_1 = arith.constant 0 : i32
    return %arg0, %c0_i32, %c0_i32_0 : i32, i32, i32
  }
}

</mosaic_0001>

<bundles_post_ra>
// kernel: tpu_custom_call.1
= control target key start
LH: loop header
LB: loop body
LE: loop exit
PB: predicated region body
PF: predicated region fallthrough
CT: control target
= control target key end

     0   :  { %s784_s21 = smov [#allocation3]   ;;  %s785_s24 = smov [#allocation4]   ;;  %s1121_s0 = inlined_call_operand.hbm [shape: s32[2,4], index: 0, kind: input, shape index: {}]   ;;  %s1122_s3 = inlined_call_operand.hbm [shape: f32[2,32,32], index: 3, kind: input, shape index: {}]   ;;  %s1123_s4 = inlined_call_operand.hbm [shape: f32[2,4,32], index: 4, kind: input, shape index: {}]   ;;  %s1124_s5 = inlined_call_operand.hbm [shape: f32[2,32,32], index: 5, kind: output, shape index: {0}]   ;;  %s1125_s6 = inlined_call_operand.hbm [shape: f32[2,1,32], index: 6, kind: output, shape index: {1}]   ;;  %s1126_s1 = inlined_call_operand.hbm [shape: s32[2,4], index: 1, kind: input, shape index: {}]   ;;  %s1127_s2 = inlined_call_operand.vmem [shape: s32[2], index: 2, kind: input, shape index: {}]  }
   0x1   :  { %13 = dma.hbm_to_smem %s1121_s0, 32, %s784_s21, [#allocation2] }
   0x2   :  { %15 = dma.hbm_to_smem %s1126_s1, 32, %s785_s24, [#allocation2] }
   0x3   :  { %s16_s29 = sshll.u32 %s1127_s2, 4  ;;  %s17_s29 = int_to_ptr.vmem [resolvable:$true] %s16_s29 }
   0x4   :  { %s614_s30 = scalar_lea.vmem %s17_s29, 16  ;;  %p619_p1 = scmp.lt.s32.totalorder %s17_s29, %s17_s29 }
   0x5   :  { %p615_p0 = scmp.ne.s32.totalorder %s17_s29, %s614_s30  ;;  %p620_p2 = scmp.lt.s32.totalorder %s614_s30, %s614_s30 }
   0x7   :  { %p621_p3 = por %p620_p2, %p619_p1 }
   0x9   :  { %p622_p4 = pnand %p621_p3, %p615_p0 }
   0xb   :  { %625 = shalt.err (!%p622_p4)  }
   0xc   :  { %s786_s7 = smov [#allocation5]  }
   0xd   :  { %19 = dma.vmem_to_smem %s17_s29, 16, %s786_s7, [#allocation2] }
   0xe   :  { %750 = dma.done.wait [#allocation2], 80 }
   0xf   :  { %751 = vsyncadd [#allocation2], 4294967216 }
  0x10   :  { %21 = sfence }
  0x11   :  { %22 = vsyncpa [#allocation7], 0 }
  0x12   :  { %24 = vsyncpa [#allocation7 + $0x1], 0 }
  0x13   :  { %25 = vsyncpa [#allocation10], 0 }
  0x14   :  { %27 = vsyncpa [#allocation10 + $0x1], 0 }
  0x15   :  { %28 = vsyncpa [#allocation8], 0 }
  0x16   :  { %30 = vsyncpa [#allocation8 + $0x1], 0 }
  0x17   :  { %31 = vsyncpa [#allocation13], 0 }
  0x18   :  { %33 = vsyncpa [#allocation13 + $0x1], 0  ;;  %s840_s0 = smov 0   ;;  %s842_s1 = smov 0  }
  0x19   :  { %s844_s2 = smov 0   ;;  %s846_s8 = smov 0  }
  0x1a LB: > { %s861_s9 = sadd.s32 4294967295, %s782_s8   ;;  %s502_s10 = sadd.s32 4294967294, %s782_s8   ;;  %s782_s8 = sphi %s846_s8, %s1146_s8   ;;  %s778_s2 = sphi %s844_s2, %s1145_s2   ;;  %s774_s1 = sphi %s842_s1, %s1144_s1   ;;  %s770_s0 = sphi %s840_s0, %s1143_s0  }
  0x1b   : > { %s865_s11 = sadd.s32 1, %s782_s8   ;;  %s46_s12 = sadd.s32 1, %s778_s2 }
  0x1c   : > { %s43_s13 = ssub.s32 %s782_s8, %s865_s11  ;;  %p53_p5 = scmp.ne.s32.totalorder %s778_s2, %s774_s1 }
  0x1d   : > { %p44_p6 = scmp.eq.s32.totalorder %s43_s13, 0  ;;  %p54_p7 = scmp.eq.s32.totalorder %s782_s8, 0 }
  0x1e   : > { %p59_p8 = scmp.ne.s32.totalorder %s774_s1, %s770_s0  ;;  %p60_p9 = scmp.eq.s32.totalorder %s861_s9, 0 }
  0x1f   : > { %s877_s14 = scalar_select %p44_p6, %s778_s2, %s46_s12  }
  0x20   : > { %p879_p10 = por %p54_p7, %p53_p5  ;;  %p883_p11 = por %p60_p9, %p59_p8 }
  0x21   : > { %p109_p12 = scmp.eq.s32.totalorder %s861_s9, 1  ;;  %p115_p13 = scmp.eq.s32.totalorder %s502_s10, 1 }
  0x22   : > { %s1131_s16 = scalar_select %p883_p11, 1, 0 }
  0x23   : > { %p556_p1 = scmp.lt.s32.totalorder %s782_s8, 2  ;;  %p890_p2 = por %p109_p12, %p53_p5 }
  0x24   : > { %p894_p3 = por %p115_p13, %p59_p8  ;;  %s899_s19 = sand.u32 1, %s778_s2  }
  0x25   : > { %s1132_s17 = scalar_select %p890_p2, 1, 0 }
  0x26   : > { %s1133_s18 = scalar_select %p894_p3, 1, 0 }
  0x27   : > { %s532_s20 = sshll.u32 %s782_s8, 9  ;;  %s505_s21 = sshll.u32 %s899_s19, 5 }
  0x28   : > { %s906_s24 = scalar_lea.hbm %s1122_s3, %s532_s20  ;;  %s165_s25 = scalar_lea.vmem [#allocation6], %s505_s21 }
  0x29   : > { %s172_s26 = sshll.u32 %s165_s25, 4  ;;  %p910_p4 = pnand %p556_p1, %p879_p10  ;;  %s914_s26 = int_to_ptr.vmem [resolvable:$true] %s172_s26 }
  0x2a   : > { %s162_s28 = scalar_lea.sflag [#allocation7], %s899_s19  ;;  %s626_s29 = scalar_lea.hbm %s906_s24, 512 }
  0x2b   : > { %p627_p5 = scmp.ne.s32.totalorder %s906_s24, %s626_s29  ;;  %p628_p6 = pneg %p910_p4 }
  0x2c   : > { %s631_s10 = scalar_lea.hbm %s1122_s3, 1024  ;;  %p632_p9 = scmp.lt.s32.totalorder %s906_s24, %s1122_s3 }
  0x2d   : > { %p629_p7 = pnand %p628_p6, %p627_p5  ;;  %p633_p10 = scmp.lt.s32.totalorder %s631_s10, %s626_s29 }
  0x2f   : > { %p630_p8 = pneg %p629_p7  ;;  %p634_p12 = por %p633_p10, %p632_p9 }
  0x31   : > { %p635_p13 = pnand %p634_p12, %p630_p8 }
  0x33   : > { %638 = shalt.err (!%p635_p13)
}
  0x34   : > { %s639_s15 = scalar_lea.vmem %s914_s26, 512  ;;  %s787_s20 = smov [#allocation6]  }
  0x35   : > { %p640_p1 = scmp.ne.s32.totalorder %s914_s26, %s639_s15  ;;  %s644_s21 = sshll.u32 %s787_s20, 4  ;;  %s645_s21 = int_to_ptr.vmem [resolvable:$false] %s644_s21 }
  0x36   : > { %s646_s22 = scalar_lea.vmem %s645_s21, 1024  ;;  %p647_p0 = scmp.lt.s32.totalorder %s914_s26, %s645_s21 }
  0x37   : > { %p642_p5 = pnand %p640_p1, %p628_p6  ;;  %p648_p3 = scmp.lt.s32.totalorder %s646_s22, %s639_s15 }
  0x39   : > { %p643_p7 = pneg %p642_p5  ;;  %p649_p2 = por %p648_p3, %p647_p0 }
  0x3b   : > { %p650_p9 = pnand %p649_p2, %p643_p7 }
  0x3d   : > { %653 = shalt.err (!%p650_p9)
}
  0x3e   : > { %s788_s23 = smov 128   ;;  %s789_s25 = smov 8  }
  0x3f   : > { %545 = dma.hbm_to_vmem [thread:$0]  (!%p910_p4), %s906_s24, 512, %s914_s26, %s162_s28, %s788_s23, %s788_s23, %s789_s25  }
  0x40   : > { %p510_p8 = scmp.ge.s32.totalorder %s782_s8, 1  ;;  %p198_p10 = scmp.lt.s32.totalorder %s782_s8, 3 }
  0x41   : > { %s508_s29 = sshll.u32 %s899_s19, 2  ;;  %s509_s7 = sshll.u32 %s782_s8, 6 }
  0x42   : > { %p946_p0 = pnand %p510_p8, %p198_p10  ;;  %s186_s10 = scalar_lea.vmem [#allocation9], %s508_s29 }
  0x43   : > { %s193_s12 = sshll.u32 %s186_s10, 4  ;;  %s191_s20 = scalar_lea.hbm %s1123_s4, %s509_s7  ;;  %s194_s12 = int_to_ptr.vmem [resolvable:$true] %s193_s12 }
  0x44   : > { %s1135_s30 = scalar_select %p946_p0, 1, 0 }
  0x45   : > { %s183_s21 = scalar_lea.sflag [#allocation10], %s899_s19  ;;  %s654_s22 = scalar_lea.hbm %s191_s20, 64 }
  0x46   : > { %p655_p2 = scmp.ne.s32.totalorder %s191_s20, %s654_s22  ;;  %s659_s28 = scalar_lea.hbm %s1123_s4, 128 }
  0x47   : > { %p660_p13 = scmp.lt.s32.totalorder %s191_s20, %s1123_s4  ;;  %p661_p1 = scmp.lt.s32.totalorder %s659_s28, %s654_s22 }
  0x48   : > { %p657_p3 = pnand %p655_p2, %p628_p6 }
  0x49   : > { %p662_p5 = por %p661_p1, %p660_p13 }
  0x4a   : > { %p658_p12 = pneg %p657_p3 }
  0x4c   : > { %p663_p7 = pnand %p662_p5, %p658_p12 }
  0x4e   : > { %666 = shalt.err (!%p663_p7)
}
  0x4f   : > { %s667_s29 = scalar_lea.vmem %s194_s12, 64  ;;  %s790_s19 = smov [#allocation9]  }
  0x50   : > { %p668_p9 = scmp.ne.s32.totalorder %s194_s12, %s667_s29  ;;  %s672_s7 = sshll.u32 %s790_s19, 4  ;;  %s673_s7 = int_to_ptr.vmem [resolvable:$false] %s672_s7 }
  0x51   : > { %s674_s10 = scalar_lea.vmem %s673_s7, 128  ;;  %p675_p2 = scmp.lt.s32.totalorder %s194_s12, %s673_s7 }
  0x52   : > { %p670_p8 = pnand %p668_p9, %p628_p6  ;;  %p676_p3 = scmp.lt.s32.totalorder %s674_s10, %s667_s29 }
  0x54   : > { %p671_p10 = pneg %p670_p8  ;;  %p677_p11 = por %p676_p3, %p675_p2 }
  0x56   : > { %p678_p0 = pnand %p677_p11, %p671_p10 }
  0x58   : > { %681 = shalt.err (!%p678_p0)
}
  0x59   : > { %548 = dma.hbm_to_vmem [thread:$0]  (!%p910_p4), %s191_s20, 64, %s194_s12, %s183_s21  }
  0x5a   : > { %p1136_p12 = scmp.ne.s32.totalorder %s1135_s30, 0 }
  0x5b   : > { %s972_s13 = sand.u32 (!%p1136_p12), 1, %s774_s1   ;;  %p1137_p6 = scmp.ne.s32.totalorder (!%p1136_p12), %s1131_s16, 0 }
  0x5c   : > { %202 = sbr.rel (%p1136_p12) target bundleno = 172 (0xac), region = 28  ;;  %s511_s15 = sshll.u32 (!%p1136_p12), %s972_s13, 5 }
  0x5d   : > { %s205_s22 = scalar_lea.sflag (!%p1136_p12), [#allocation7], %s972_s13  ;;  %s976_s24 = scalar_lea.vmem (!%p1136_p12), [#allocation6], %s511_s15 }
  0x61   : > { %753 = dma.done.wait (%p1137_p6), %s205_s22, 512  }
  0x62   : > { %755 = vsyncadd (%p1137_p6), %s205_s22, 4294966784  ;;  %s512_s27 = sshll.u32 %s972_s13, 2  ;;  %s214_s30 = scalar_lea.sflag [#allocation10], %s972_s13 }
  0x63   : > { %s984_s12 = scalar_lea.vmem [#allocation9], %s512_s27 }
  0x64   : > { %757 = dma.done.wait (%p1137_p6), %s214_s30, 64  }
  0x65   : > { %759 = vsyncadd (%p1137_p6), %s214_s30, 4294967232  ;;  %s991_s20 = sshll.u32 %s861_s9, 7  ;;  %v259_v0 = vlaneseq  ;;  %vm254_vm0 = vcmask 261120   ;;  %v514_v2 = vld [vmem:[%s984_s12] ss:$0 sm:$0xff]  ;;  %s999_s16 = scalar_lea.vmem [#allocation11], %s511_s15 }
  0x66   : > { %s257_s21 = sld [smem:[#allocation3 + %s991_s20]]  ;;  %s278_s28 = sadd.s32 1, %s991_s20  ;;  %255 = vst.msk [vmem:[%s999_s16] sm:$0xff] %vm254_vm0, %v514_v2  ;;  %v263_v4 = vld [vmem:[%s976_s24] sm:$0xff]  ;;  %vm341_vm2 = vcmask 253952   ;;  %v791_v12 = vmov 0.0  }
  0x67   : > { %s258_s26 = sld [smem:[#allocation4 + %s991_s20]]  ;;  %v995_v1 = vshrl.u32 %v259_v0, 7  ;;  %v336_v6 = vand.u32 127, %v259_v0  ;;  %s248_s19 = scalar_lea.vmem [#allocation12], %s972_s13  ;;  %v516_v9 = vld [vmem:[%s984_s12 + $0x1] ss:$0 sm:$0xff] }
  0x68   : > { %s1003_s23 = sld [smem:[#allocation3 + %s278_s28]]  ;;  %s377_s7 = sshll.u32 %s248_s19, 4  ;;  %s1014_s7 = int_to_ptr.vmem [resolvable:$true] %s377_s7 }
  0x69   : > { %s334_s25 = sld [smem:[#allocation5 + %s861_s9]]  ;;  %s529_s10 = sshll.u32 %s861_s9, 4 }
  0x6a   : > { %s1011_s15 = sld [smem:[#allocation4 + %s278_s28]]  ;;  %s1019_s30 = scalar_lea.hbm %s1125_s6, %s529_s10 }
  0x6b   : > { %s682_s28 = scalar_lea.vmem %s1014_s7, 16  ;;  %p1138_p4 = scmp.ne.s32.totalorder %s1132_s17, 0 }
  0x6c   : > { %v261_v3 = vstv %s257_s21  ;;  %p683_p11 = scmp.ne.s32.totalorder %s1014_s7, %s682_s28 }
  0x6d   : > { %vm262_vm1 = vcmp.lt.s32.totalorder %v995_v1, %v261_v3  ;;  %s267_s29 = scalar_lea.vmem %s999_s16, %s258_s26 [#allocation11]  ;;  %s349_s26 = scalar_lea.sflag [#allocation13], %s972_s13 }
  0x6e   : > { %v266_v5 = vsel %vm262_vm1, %v263_v4, 0.0  ;;  %v268_v7 = vld [vmem:[%s267_s29] sm:$0xff]  ;;  %v281_v11 = vstv %s1003_s23  ;;  %p684_p0 = pnand %p683_p11, %p1138_p4 }
  0x6f   : > { %v269_v8 = vadd.f32 %v268_v7, %v266_v5  ;;  %v337_v10 = vstv %s334_s25  ;;  %s792_s25 = smov [#allocation12]  }
  0x70   : > { %vm338_vm3 = vcmp.lt.s32.totalorder %v336_v6, %v337_v10  ;;  %p685_p13 = pneg %p684_p0  ;;  %s686_s22 = sshll.u32 %s792_s25, 4  ;;  %s687_s22 = int_to_ptr.vmem [resolvable:$false] %s686_s22 }
  0x71   : > { %270 = vst.msk [vmem:[%s267_s29] sm:$0xff] %vm254_vm0, %v269_v8  ;;  %v525_v13 = vsel %vm338_vm3, 1.0, %v791_v12  ;;  %s688_s10 = scalar_lea.vmem %s687_s22, 32  ;;  %p689_p1 = scmp.lt.s32.totalorder %s1014_s7, %s687_s22 }
  0x72   : > { %517 = vst.msk [vmem:[%s999_s16 + $0x8] sm:$0xff] %vm254_vm0, %v516_v9  ;;  %p690_p5 = scmp.lt.s32.totalorder %s688_s10, %s682_s28 }
  0x73   : > { %342 = vst.msk [vmem:[%s248_s19] sm:$0x1] %vm341_vm2, %v525_v13 }
  0x74   : > { %p691_p7 = por %p690_p5, %p689_p1 }
  0x76   : > { %p692_p9 = pnand %p691_p7, %p685_p13 }
  0x78   : > { %695 = shalt.err (!%p692_p9)
}
  0x79   : > { %s696_s23 = scalar_lea.hbm %s1019_s30, 16  ;;  %s700_s27 = scalar_lea.hbm %s1125_s6, 32 }
  0x7a   : > { %p697_p8 = scmp.ne.s32.totalorder %s1019_s30, %s696_s23  ;;  %p701_p3 = scmp.lt.s32.totalorder %s1019_s30, %s1125_s6 }
  0x7b   : > { %p702_p12 = scmp.lt.s32.totalorder %s700_s27, %s696_s23 }
  0x7c   : > { %p698_p10 = pnand %p697_p8, %p1138_p4 }
  0x7d   : > { %p703_p6 = por %p702_p12, %p701_p3 }
  0x7e   : > { %p699_p2 = pneg %p698_p10 }
  0x80   : > { %p704_p11 = pnand %p703_p6, %p699_p2 }
  0x82   : > { %707 = shalt.err (!%p704_p11)
}
  0x83   : > { %539 = dma.vmem_to_hbm [thread:$0]  (%p1138_p4), %s1014_s7, 16, %s1019_s30, %s349_s26   ;;  %vm282_vm4 = vcmp.lt.s32.totalorder %v995_v1, %v281_v11  ;;  %v518_v14 = vld [vmem:[%s976_s24 + $0x8] sm:$0xff]  ;;  %v519_v18 = vld [vmem:[%s984_s12 + $0x2] ss:$0 sm:$0xff]  ;;  %v521_v20 = vld [vmem:[%s976_s24 + $0x10] sm:$0xff] }
  0x84   : > { %s1139_s28 = sadd.s32 2, %s991_s20  ;;  %s288_s22 = scalar_lea.vmem %s999_s16, %s1011_s15 [#allocation11]  ;;  %v287_v15 = vsel %vm282_vm4, %v518_v14, 0.0  ;;  %v522_v24 = vld [vmem:[%s984_s12 + $0x3] ss:$0 sm:$0xff]  ;;  %v524_v26 = vld [vmem:[%s976_s24 + $0x18] sm:$0xff] }
  0x85   : > { %s300_s21 = sld [smem:[#allocation3 + %s1139_s28]]  ;;  %s1140_s10 = smov %s1139_s28  ;;  %v289_v16 = vld [vmem:[%s288_s22] sm:$0xff] }
  0x86   : > { %s301_s23 = sld [smem:[#allocation4 + %s1140_s10]]  ;;  %v290_v17 = vadd.f32 %v289_v16, %v287_v15  ;;  %s320_s29 = sadd.s32 3, %s991_s20 }
  0x87   : > { %s321_s7 = sld [smem:[#allocation3 + %s320_s29]]  ;;  %s361_s20 = sshll.u32 %s999_s16, 4  ;;  %s1072_s20 = int_to_ptr.vmem [resolvable:$true] %s361_s20 }
  0x88   : > { %291 = vst.msk [vmem:[%s288_s22] sm:$0xff] %vm254_vm0, %v290_v17  ;;  %s322_s30 = sld [smem:[#allocation4 + %s320_s29]]  ;;  %s533_s19 = sshll.u32 %s861_s9, 9 }
  0x89   : > { %520 = vst.msk [vmem:[%s999_s16 + $0x10] sm:$0xff] %vm254_vm0, %v519_v18  ;;  %s1077_s25 = scalar_lea.hbm %s1124_s5, %s533_s19  ;;  %s344_s28 = scalar_lea.sflag [#allocation8], %s972_s13 }
  0x8a   : > { %s708_s24 = scalar_lea.vmem %s1072_s20, 512  ;;  %s793_s9 = smov [#allocation11]  }
  0x8b   : > { %v302_v19 = vstv %s300_s21  ;;  %p709_p0 = scmp.ne.s32.totalorder %s1072_s20, %s708_s24 }
  0x8c   : > { %vm303_vm5 = vcmp.lt.s32.totalorder %v995_v1, %v302_v19  ;;  %s309_s15 = scalar_lea.vmem %s999_s16, %s301_s23 [#allocation11] }
  0x8d   : > { %v308_v21 = vsel %vm303_vm5, %v521_v20, 0.0  ;;  %v323_v25 = vstv %s321_s7  ;;  %p710_p13 = pnand %p709_p0, %p1138_p4 }
  0x8e   : > { %vm324_vm6 = vcmp.lt.s32.totalorder %v995_v1, %v323_v25  ;;  %s330_s26 = scalar_lea.vmem %s999_s16, %s322_s30 [#allocation11] }
  0x8f   : > { %v329_v27 = vsel %vm324_vm6, %v524_v26, 0.0  ;;  %p711_p1 = pneg %p710_p13 }
  0x90   : > { %v310_v22 = vld [vmem:[%s309_s15] sm:$0xff] }
  0x91   : > { %v311_v23 = vadd.f32 %v310_v22, %v308_v21 }
  0x93   : > { %312 = vst.msk [vmem:[%s309_s15] sm:$0xff] %vm254_vm0, %v311_v23 }
  0x94   : > { %523 = vst.msk [vmem:[%s999_s16 + $0x18] sm:$0xff] %vm254_vm0, %v522_v24  ;;  %s712_s16 = sshll.u32 %s793_s9, 4  ;;  %s713_s16 = int_to_ptr.vmem [resolvable:$false] %s712_s16 }
  0x95   : > { %s714_s21 = scalar_lea.vmem %s713_s16, 1024  ;;  %p715_p5 = scmp.lt.s32.totalorder %s1072_s20, %s713_s16 }
  0x96   : > { %p716_p7 = scmp.lt.s32.totalorder %s714_s21, %s708_s24 }
  0x98   : > { %p717_p9 = por %p716_p7, %p715_p5 }
  0x9a   : > { %p718_p8 = pnand %p717_p9, %p711_p1 }
  0x9b   : > { %v331_v28 = vld [vmem:[%s330_s26] sm:$0xff] }
  0x9c   : > { %v332_v29 = vadd.f32 %v331_v28, %v329_v27 }
  0x9e   : > { %333 = vst.msk [vmem:[%s330_s26] sm:$0xff] %vm254_vm0, %v332_v29 }
  0x9f   : > { %721 = shalt.err (!%p718_p8)
}
  0xa0   : > { %s722_s22 = scalar_lea.hbm %s1077_s25, 512  ;;  %s726_s29 = scalar_lea.hbm %s1124_s5, 1024 }
  0xa1   : > { %p723_p10 = scmp.ne.s32.totalorder %s1077_s25, %s722_s22  ;;  %p727_p12 = scmp.lt.s32.totalorder %s1077_s25, %s1124_s5 }
  0xa2   : > { %p728_p6 = scmp.lt.s32.totalorder %s726_s29, %s722_s22 }
  0xa3   : > { %p724_p2 = pnand %p723_p10, %p1138_p4 }
  0xa4   : > { %p729_p11 = por %p728_p6, %p727_p12 }
  0xa5   : > { %p725_p3 = pneg %p724_p2 }
  0xa7   : > { %p730_p0 = pnand %p729_p11, %p725_p3 }
  0xa9   : > { %733 = shalt.err (!%p730_p0)
}
  0xaa   : > { %s794_s30 = smov 128   ;;  %s795_s26 = smov 8  }
  0xab   : > { %538 = dma.vmem_to_hbm [thread:$0]  (%p1138_p4), %s1072_s20, 512, %s1077_s25, %s344_s28, %s794_s30, %s794_s30, %s795_s26  }
  0xac PF: > { %s389_s19 = sand.u32 1, %s770_s0   ;;  %p1141_p13 = scmp.ne.s32.totalorder %s1133_s18, 0 }
  0xad   : > { %p1142_p1 = scmp.ge.s32.totalorder %s782_s8, 2  ;;  %s390_s12 = scalar_lea.sflag [#allocation8], %s389_s19 }
  0xaf   : > { %p550_p5 = pnand %p1142_p1, %p1141_p13 }
  0xb1   : > { %p551_p7 = pneg %p550_p5 }
  0xb3   : > { %761 = dma.done.wait (%p551_p7), %s390_s12, 512  }
  0xb4   : > { %763 = vsyncadd (%p551_p7), %s390_s12, 4294966784  ;;  %s399_s27 = scalar_lea.sflag [#allocation13], %s389_s19 }
  0xb5   : > { %765 = dma.done.wait (%p551_p7), %s399_s27, 16  }
  0xb6   : > { %767 = vsyncadd (%p551_p7), %s399_s27, 4294967280  ;;  %p36_p4 = scmp.ge.s32.totalorder %s865_s11, 4   ;;  %s1143_s0 = smov %s774_s1 }
  0xb7   : > { %s1144_s1 = smov %s778_s2  ;;  %s1145_s2 = smov %s877_s14 }
  0xb8   : > { %s1146_s8 = smov %s865_s11  ;;  %38 = sbr.rel (!%p36_p4) target bundleno = 26 (0x1a), region = 113 }
  0xbd   :  { %403 = vsyncpa [#allocation7], 1 }
  0xbe   :  { %405 = vsyncpa [#allocation7 + $0x1], 1 }
  0xbf   :  { %406 = vsyncpa [#allocation10], 1 }
  0xc0   :  { %408 = vsyncpa [#allocation10 + $0x1], 1 }
  0xc1   :  { %409 = vsyncpa [#allocation8], 1 }
  0xc2   :  { %411 = vsyncpa [#allocation8 + $0x1], 1 }
  0xc3   :  { %412 = vsyncpa [#allocation13], 1 }
  0xc4   :  { %414 = vsyncpa [#allocation13 + $0x1], 1 }

</bundles_post_ra>
